<compile_context>
chip_gen: v7x
topology: tpu7x:2x2x1
jax: 0.10.0
libtpu: 0.0.40
codegen_flags: <defaults>
</compile_context>

<pallas_src>
import functools

import jax
import jax.numpy as jnp
from jax.experimental import pallas as pl
from jax.experimental.pallas import tpu as pltpu

_LANE = 128


def _round_up(v, m):
    return (v + m - 1) // m * m


def _sublane(dtype):
    # Second-minor tile multiple: 8 for 4-byte, 16 for 2-byte, 32 for 1-byte dtypes.
    return max(8, 32 // jnp.dtype(dtype).itemsize)


def _vmem_capacity_bytes():
    try:
        cap = getattr(pltpu.get_tpu_info(), "vmem_capacity_bytes", None)
        if cap:
            return int(cap)
    except Exception:
        pass
    return 64 << 20  # conservative fallback (v7x per-TensorCore VMEM)


def _const_spec(block_shape, index_map, single_buffered):
    # Blocks with a constant index_map (weight / folded bias) don't need
    # double-buffering; requesting a single buffer halves their VMEM footprint.
    if single_buffered and hasattr(pl, "Buffered"):
        return pl.BlockSpec(block_shape, index_map,
                            pipeline_mode=pl.Buffered(buffer_count=1))
    return pl.BlockSpec(block_shape, index_map)


def _perm_equi2_mean_kernel(x_ref, w_ref, c_ref, o_ref):
    # x_ref: (tn, in_dim)    tile of the input set (last tile may be ragged/masked)
    # w_ref: (in_dim, tout)  Gamma weight (pre-transposed), resident or streamed
    # c_ref: (1, tout)       folded bias: Gamma_b - mean(x,0) @ Lambda_W.T  (f32)
    # o_ref: (tn, tout)
    acc = jnp.dot(x_ref[...], w_ref[...], preferred_element_type=jnp.float32)
    o_ref[...] = (acc + c_ref[...]).astype(o_ref.dtype)


@functools.partial(jax.jit, static_argnames=("block_n",))
def perm_equi2_mean(x, gamma_w, gamma_b, lambda_w, *, block_n=1024):
    """x: (N, in_dim); gamma_w/lambda_w: (out_dim, in_dim); gamma_b: (out_dim,)."""
    n, in_dim = x.shape
    out_dim = gamma_w.shape[0]

    # ---- Fold Lambda(mean(x)) and the Gamma bias into one (1, out_dim) f32 term.
    # The mean is the exact global reduction over the true N rows.
    # TODO(synk): when in_dim >> out_dim, the column-sum of x could instead be
    # produced by the kernel itself (second accumulated output) to save this
    # extra HBM read of x; for typical DeepSets widths the fold is cheaper.
    xm = jnp.mean(x.astype(jnp.float32), axis=0, keepdims=True)         # (1, in_dim)
    c = (gamma_b.astype(jnp.float32).reshape(1, out_dim)
         - xm @ jnp.transpose(lambda_w).astype(jnp.float32))            # (1, out_dim)

    gw_t = jnp.transpose(gamma_w)                                       # (in_dim, out_dim)

    x_isz = jnp.dtype(x.dtype).itemsize
    w_isz = jnp.dtype(gw_t.dtype).itemsize
    o_isz = x_isz
    sub = _sublane(x.dtype)

    # VMEM-footprint dims (Mosaic pads the lane dim internally; no HBM padding).
    in_r = _round_up(in_dim, _LANE)
    out_r = _round_up(out_dim, _LANE)

    cap = _vmem_capacity_bytes()
    usable = max(cap - (16 << 20), 8 << 20)   # headroom for Mosaic internal scratch

    # ---- Stream the weight over an out_dim grid axis only if keeping it fully
    # resident would eat more than ~1/4 of usable VMEM (wide features on v7x).
    if in_r * out_r * w_isz <= usable // 4:
        tout, out_tiles = out_dim, 1
    else:
        tout = max(_LANE, ((usable // 4) // (2 * in_r * w_isz)) // _LANE * _LANE)
        tout = min(tout, out_r)
        out_tiles = pl.cdiv(out_dim, tout)
    tout_r = out_r if out_tiles == 1 else tout

    # ---- N tile: dtype-aware sublane multiple; aim for >=2 tiles so both v7x
    # TensorCores get work; shrink until the VMEM budget fits.
    tn = min(block_n, max(sub, _round_up(pl.cdiv(n, 2), sub)))

    def budget(tn_):
        w_bufs = 1 if out_tiles == 1 else 2
        return (2 * tn_ * in_r * x_isz               # x tiles (double-buffered)
                + w_bufs * in_r * tout_r * w_isz     # weight
                + w_bufs * 8 * tout_r * 4            # folded bias (f32)
                + 2 * tn_ * tout_r * o_isz           # out tiles (double-buffered)
                + tn_ * tout_r * 4)                  # implicit f32 matmul result

    while tn > sub and budget(tn) > usable:
        tn = max(sub, _round_up(tn // 2, sub))

    vmem_limit = int(min(usable, max(budget(tn) + (4 << 20), 32 << 20)))

    grid = (pl.cdiv(n, tn), out_tiles)
    single = out_tiles == 1

    cost = pl.CostEstimate(
        flops=int(2 * n * in_dim * out_dim),
        transcendentals=0,
        bytes_accessed=int(n * in_dim * x_isz + in_dim * out_dim * w_isz
                           + out_dim * 4 + n * out_dim * o_isz),
    )

    return pl.pallas_call(
        _perm_equi2_mean_kernel,
        out_shape=jax.ShapeDtypeStruct((n, out_dim), x.dtype),
        grid_spec=pltpu.PrefetchScalarGridSpec(
            num_scalar_prefetch=0,
            grid=grid,
            in_specs=[
                pl.BlockSpec((tn, in_dim), lambda i, j: (i, 0)),          # x: tiled over N
                _const_spec((in_dim, tout), lambda i, j: (0, j), single),  # weight
                _const_spec((1, tout), lambda i, j: (0, j), single),       # folded bias
            ],
            out_specs=pl.BlockSpec((tn, tout), lambda i, j: (i, j)),
        ),
        compiler_params=pltpu.CompilerParams(
            dimension_semantics=("parallel", "arbitrary"),
            vmem_limit_bytes=vmem_limit,
        ),
        cost_estimate=cost,
    )(x, gw_t, c)


def _reference(x, gamma_w, gamma_b, lambda_w):
    xm = jnp.mean(x, axis=0, keepdims=True)
    return x @ gamma_w.T + gamma_b - xm @ lambda_w.T


if __name__ == "__main__":
    # Small shapes implied by the module: a set of N feature vectors.
    N, IN_DIM, OUT_DIM = 8, 32, 32

    key = jax.random.PRNGKey(0)
    kx, kgw, kgb, klw = jax.random.split(key, 4)

    # Deterministic init ~ PyTorch nn.Linear default scale U[-1/sqrt(in), 1/sqrt(in)].
    bound = 1.0 / (IN_DIM ** 0.5)
    x = jax.random.normal(kx, (N, IN_DIM), dtype=jnp.float32)
    gamma_w = jax.random.uniform(kgw, (OUT_DIM, IN_DIM), jnp.float32, -bound, bound)
    gamma_b = jax.random.uniform(kgb, (OUT_DIM,), jnp.float32, -bound, bound)
    lambda_w = jax.random.uniform(klw, (OUT_DIM, IN_DIM), jnp.float32, -bound, bound)

    out = jax.block_until_ready(perm_equi2_mean(x, gamma_w, gamma_b, lambda_w))
    ref = _reference(x, gamma_w, gamma_b, lambda_w)
    assert out.shape == (N, OUT_DIM), out.shape
    assert jnp.allclose(out, ref, atol=1e-5, rtol=1e-5), (
        float(jnp.max(jnp.abs(out - ref))))

    # Ragged / unpadded path: N not a multiple of the tile (masked last tile,
    # no HBM padding) and feature dims not multiples of 128 (full-extent blocks).
    N2, IN2, OUT2 = 13, 48, 80
    kx2, kgw2, kgb2, klw2 = jax.random.split(jax.random.PRNGKey(1), 4)
    b2 = 1.0 / (IN2 ** 0.5)
    x2 = jax.random.normal(kx2, (N2, IN2), dtype=jnp.float32)
    gw2 = jax.random.uniform(kgw2, (OUT2, IN2), jnp.float32, -b2, b2)
    gb2 = jax.random.uniform(kgb2, (OUT2,), jnp.float32, -b2, b2)
    lw2 = jax.random.uniform(klw2, (OUT2, IN2), jnp.float32, -b2, b2)
    out2 = jax.block_until_ready(perm_equi2_mean(x2, gw2, gb2, lw2))
    ref2 = _reference(x2, gw2, gb2, lw2)
    assert out2.shape == (N2, OUT2), out2.shape
    assert jnp.allclose(out2, ref2, atol=1e-5, rtol=1e-5), (
        float(jnp.max(jnp.abs(out2 - ref2))))

    print("KERNEL_OK")
</pallas_src>

<mosaic_0001>
module attributes {stable_mosaic.version = 11 : i64} {
  func.func @_perm_equi2_mean_kernel(%arg0: i32, %arg1: i32, %arg2: memref<8x32xf32, #tpu.memory_space<vmem>>, %arg3: memref<32x32xf32, #tpu.memory_space<vmem>>, %arg4: memref<1x32xf32, #tpu.memory_space<vmem>>, %arg5: memref<8x32xf32, #tpu.memory_space<vmem>>) attributes {dimension_semantics = [#tpu.dimension_semantics<parallel>, #tpu.dimension_semantics<arbitrary>], iteration_bounds = array<i64: 1, 1>, scalar_prefetch = 0 : i64, scratch_operands = 0 : i64, tpu.core_type = #tpu.core_type<tc>, window_params = [{transform_indices = @transform_0, window_bounds = array<i64: 8, 32>}, {pipeline_mode = #tpu.pipeline_mode<synchronous>, transform_indices = @transform_1, window_bounds = array<i64: 32, 32>}, {pipeline_mode = #tpu.pipeline_mode<synchronous>, transform_indices = @transform_2, window_bounds = array<i64: 1, 32>}, {transform_indices = @transform_3, window_bounds = array<i64: 8, 32>}]} {
    %c0 = arith.constant 0 : index
    %c0_0 = arith.constant 0 : index
    %0 = vector.load %arg2[%c0, %c0_0] : memref<8x32xf32, #tpu.memory_space<vmem>>, vector<8x32xf32>
    %c0_1 = arith.constant 0 : index
    %c0_2 = arith.constant 0 : index
    %1 = vector.load %arg3[%c0_1, %c0_2] : memref<32x32xf32, #tpu.memory_space<vmem>>, vector<32x32xf32>
    %cst = arith.constant dense<0.000000e+00> : vector<8x32xf32>
    %2 = tpu.matmul %0, %1, %cst {dimension_numbers = #tpu.dot_dimension_numbers<[1], [0], [0], [1], [0, 0, 1, 1], [], []>} : vector<8x32xf32>, vector<32x32xf32>, vector<8x32xf32> -> vector<8x32xf32>
    %c0_3 = arith.constant 0 : index
    %c0_4 = arith.constant 0 : index
    %3 = vector.load %arg4[%c0_3, %c0_4] : memref<1x32xf32, #tpu.memory_space<vmem>>, vector<1x32xf32>
    %4 = vector.broadcast %3 : vector<1x32xf32> to vector<8x32xf32>
    %5 = arith.addf %2, %4 : vector<8x32xf32>
    %c0_5 = arith.constant 0 : index
    %c0_6 = arith.constant 0 : index
    %6 = vector.load %arg5[%c0_5, %c0_6] : memref<8x32xf32, #tpu.memory_space<vmem>>, vector<8x32xf32>
    tpu.vector_store %arg5[%c0_5, %c0_6], %5 {strides = array<i32>} : memref<8x32xf32, #tpu.memory_space<vmem>>, vector<8x32xf32>,
    return
  }
  func.func @transform_0(%arg0: i32, %arg1: i32) -> (i32, i32) {
    %c0_i32 = arith.constant 0 : i32
    %c0_i32_0 = arith.constant 0 : i32
    return %arg0, %c0_i32 : i32, i32
  }
  func.func @transform_1(%arg0: i32, %arg1: i32) -> (i32, i32) {
    %c0_i32 = arith.constant 0 : i32
    %c0_i32_0 = arith.constant 0 : i32
    return %c0_i32, %arg1 : i32, i32
  }
  func.func @transform_2(%arg0: i32, %arg1: i32) -> (i32, i32) {
    %c0_i32 = arith.constant 0 : i32
    %c0_i32_0 = arith.constant 0 : i32
    return %c0_i32, %arg1 : i32, i32
  }
  func.func @transform_3(%arg0: i32, %arg1: i32) -> (i32, i32) {
    %c0_i32 = arith.constant 0 : i32
    return %arg0, %arg1 : i32, i32
  }
}

</mosaic_0001>

<bundles_post_ra>
// kernel: perm_equi2_mean.1
= control target key start
LH: loop header
LB: loop body
LE: loop exit
PB: predicated region body
PF: predicated region fallthrough
CT: control target
= control target key end

     0   :  { %v168_v3 = vmov 0.0|0.0   ;;  %vm169_vm0 = vmmov 0   ;;  %v170_v6 = vmov 0.0   ;;  %s222_s0 = inlined_call_operand.vmem [shape: f32[8,32], index: 0, kind: input, shape index: {}]   ;;  %s223_s1 = inlined_call_operand.vmem [shape: f32[32,32], index: 1, kind: input, shape index: {}]   ;;  %s224_s2 = inlined_call_operand.vmem [shape: f32[1,32], index: 2, kind: input, shape index: {}]   ;;  %s225_s3 = inlined_call_operand.hbm [shape: f32[8,32], index: 3, kind: output, shape index: {}]  }
   0x1   :  { %v16_v0 = vld [vmem:[%s223_s1] sm:$0xff]  ;;  %v17_v1 = vld [vmem:[%s223_s1 + $0x8] sm:$0xff]  ;;  %v18_v2 = vld [vmem:[%s223_s1 + $0x10] sm:$0xff]  ;;  %134 = vmatprep.subr.bf16.mxu0 %v168_v3  ;;  %131 = vmatprep.mubr.msk.f32.mxu0 %vm169_vm0, %v170_v6 }
   0x2   :  { %v135_v4 = vpack.c.bf16 %v17_v1, %v16_v0  ;;  %v19_v5 = vld [vmem:[%s223_s1 + $0x18] sm:$0xff] }
   0x3   :  { %8 = vsyncpa [#allocation3], 0  ;;  %v138_v7 = vpack.c.bf16 %v19_v5, %v18_v2  ;;  %v15_v8 = vld [vmem:[%s222_s0] sm:$0xff]  ;;  %vm27_vm1 = vcmask 261120   ;;  %s171_s24 = smov [#allocation2]  }
   0x4   :  { %136 = vmatpush3.bf16.msra.mxu0 %v135_v4  ;;  %v116_v9 = vld [vmem:[%s224_s2] ss:$0 sm:$0xff]  ;;  %s108_s1 = sshll.u32 %s171_s24, 4  ;;  %s109_s1 = int_to_ptr.vmem [resolvable:$true] %s108_s1 }
   0x5   :  { %137 = vmatprep.subr.bf16.mxu0 %v168_v3  ;;  %s144_s25 = scalar_lea.vmem %s109_s1, 128  ;;  %p149_p1 = scmp.lt.s32.totalorder %s109_s1, %s109_s1 }
   0x6   :  { %p145_p0 = scmp.ne.s32.totalorder %s109_s1, %s144_s25  ;;  %p150_p2 = scmp.lt.s32.totalorder %s144_s25, %s144_s25 }
   0x8   :  { %139 = vmatpush3.bf16.msra.mxu0 %v138_v7  ;;  %p151_p3 = por %p150_p2, %p149_p1 }
   0xa   :  { %p152_p4 = pnand %p151_p3, %p145_p0 }
   0xb   :  { %132 = vmatmul.mubr.msk.f32.vlgmr.msra.gmra.mrb[0].mxu0 %vm27_vm1, %v15_v8 }
  0xde   :  { %v97_v10 = vpop.f32.mrb[0].mxu0 }
  0xdf   :  { %v98_v11 = vadd.f32 %v116_v9, %v97_v10  ;;  %v133_v12 = vpop.f32.mrb[1].mxu0 }
  0xe1   :  { %101 = vst.msk [vmem:[#allocation2] sm:$0xff] %vm27_vm1, %v98_v11 }
  0xe2   :  { %155 = shalt.err (!%p152_p4)
}
  0xe3   :  { %s156_s27 = scalar_lea.hbm %s225_s3, 128 }
  0xe4   :  { %p157_p5 = scmp.ne.s32.totalorder %s225_s3, %s156_s27  ;;  %p160_p6 = scmp.lt.u32.totalorder %s156_s27, %s225_s3 }
  0xe6   :  { %p162_p7 = pnand %p160_p6, %p157_p5 }
  0xe8   :  { %165 = shalt.err (!%p162_p7)
}
  0xe9   :  { %111 = dma.vmem_to_hbm [thread:$0]  %s109_s1, 128, %s225_s3, [#allocation3]  }
  0xea   :  { %166 = dma.done.wait [#allocation3], 128  }
  0xeb   :  { %167 = vsyncadd [#allocation3], 4294967168 }
  0xec   :  { %115 = vsyncpa [#allocation3], 1 }

</bundles_post_ra>
